<compile_context>
chip_gen: v5e
topology: v5e:2x2
jax: 0.10.0
libtpu: 0.0.40
codegen_flags: <defaults>
</compile_context>

<pallas_src>
import functools

import jax
import jax.numpy as jnp
from jax.experimental import pallas as pl
from jax.experimental.pallas import tpu as pltpu

LANE = 128
SUBLANE = 8


def _round_up(x, m):
    return (x + m - 1) // m * m


def actor_critic_kernel(x_ref, w1_ref, w2h_ref, b_ref, out_ref, *, hid_p, out_p):
    """One batch tile of the fused forward pass.

    x_ref   : (TB, obs_p)
    w1_ref  : (obs_p, hid_p)
    w2h_ref : (hid_p, hid_p + out_p)   -- [w2 | w_policy | w_value] packed on the out axis
    b_ref   : (1, 2*hid_p + out_p)     -- [b1 | b2 | b_policy | b_value]
    out_ref : (TB, out_p)              -- [policy | value | zero-pad] packed on lanes
    """
    x = x_ref[...]

    # static, lane-aligned slices of the packed buffers (no runtime cost)
    w2 = w2h_ref[:, 0:hid_p]
    wh = w2h_ref[:, hid_p:hid_p + out_p]
    b1 = b_ref[:, 0:hid_p]
    b2 = b_ref[:, hid_p:2 * hid_p]
    bh = b_ref[:, 2 * hid_p:2 * hid_p + out_p]

    # shared trunk: Linear -> ReLU -> Linear -> ReLU
    h1 = jnp.maximum(
        jnp.dot(x, w1_ref[...], preferred_element_type=jnp.float32) + b1, 0.0)
    h2 = jnp.maximum(
        jnp.dot(h1, w2, preferred_element_type=jnp.float32) + b2, 0.0)

    # fused policy|value head: one matmul, one lane-dense store
    out_ref[...] = (
        jnp.dot(h2, wh, preferred_element_type=jnp.float32) + bh
    ).astype(out_ref.dtype)


def actor_critic_forward(x, params, *, batch_tile=256):
    """x: (B, obs_dim) float32. Returns (policy (B, act_dim), value (B, 1))."""
    B, obs_dim = x.shape
    hidden = params["w1"].shape[1]
    act_dim = params["wp"].shape[1]
    out_dim = act_dim + 1                      # fused policy|value head width

    obs_p = _round_up(obs_dim, LANE)
    hid_p = _round_up(hidden, LANE)
    out_p = _round_up(out_dim, LANE)

    tb = min(_round_up(B, SUBLANE), _round_up(batch_tile, SUBLANE))
    B_p = _round_up(B, tb)
    grid = (B_p // tb,)

    f32 = jnp.float32
    # ---- host-side zero-pad + pack (cheap XLA ops, amortized over the batch) ----
    x_p = jnp.zeros((B_p, obs_p), f32).at[:B, :obs_dim].set(x.astype(f32))

    w1_p = jnp.zeros((obs_p, hid_p), f32).at[:obs_dim, :hidden].set(params["w1"])
    w2_p = jnp.zeros((hid_p, hid_p), f32).at[:hidden, :hidden].set(params["w2"])
    wh_p = (jnp.zeros((hid_p, out_p), f32)
            .at[:hidden, :act_dim].set(params["wp"])
            .at[:hidden, act_dim:out_dim].set(params["wv"]))
    w2h = jnp.concatenate([w2_p, wh_p], axis=1)            # (hid_p, hid_p + out_p)

    b = (jnp.zeros((1, 2 * hid_p + out_p), f32)
         .at[0, 0:hidden].set(params["b1"].reshape(-1))
         .at[0, hid_p:hid_p + hidden].set(params["b2"].reshape(-1))
         .at[0, 2 * hid_p:2 * hid_p + act_dim].set(params["bp"].reshape(-1))
         .at[0, 2 * hid_p + act_dim:2 * hid_p + out_dim].set(params["bv"].reshape(-1)))

    kernel = functools.partial(actor_critic_kernel, hid_p=hid_p, out_p=out_p)

    flops = 2 * B_p * (obs_p * hid_p + hid_p * hid_p + hid_p * out_p)
    bytes_accessed = 4 * (x_p.size + w1_p.size + w2h.size + b.size + B_p * out_p)

    fused = pl.pallas_call(
        kernel,
        out_shape=jax.ShapeDtypeStruct((B_p, out_p), f32),
        grid=grid,
        in_specs=[
            pl.BlockSpec((tb, obs_p), lambda i: (i, 0)),             # x: tiled on batch
            pl.BlockSpec((obs_p, hid_p), lambda i: (0, 0)),          # w1: VMEM-resident
            pl.BlockSpec((hid_p, hid_p + out_p), lambda i: (0, 0)),  # w2|heads: resident
            pl.BlockSpec((1, 2 * hid_p + out_p), lambda i: (0, 0)),  # biases: resident
        ],
        out_specs=pl.BlockSpec((tb, out_p), lambda i: (i, 0)),
        compiler_params=pltpu.CompilerParams(
            dimension_semantics=("parallel",)),      # batch axis -> both TCs on v7x
        cost_estimate=pl.CostEstimate(
            flops=flops, transcendentals=0, bytes_accessed=bytes_accessed),
    )(x_p, w1_p, w2h, b)

    policy = fused[:B, :act_dim]
    value = fused[:B, act_dim:out_dim]
    return policy, value


def init_params(key, obs_dim, act_dim, hidden):
    """Deterministic synthetic init (PyTorch-Linear-like uniform fan-in scaling).

    Weights stored transposed vs PyTorch: (in_features, out_features) so the
    kernel computes y = x @ W + b directly on the MXU.
    """
    def linear(k, fan_in, fan_out):
        kw, kb = jax.random.split(k)
        bound = 1.0 / jnp.sqrt(fan_in)
        w = jax.random.uniform(kw, (fan_in, fan_out), jnp.float32, -bound, bound)
        b = jax.random.uniform(kb, (fan_out,), jnp.float32, -bound, bound)
        return w, b

    k1, k2, k3, k4 = jax.random.split(key, 4)
    w1, b1 = linear(k1, obs_dim, hidden)
    w2, b2 = linear(k2, hidden, hidden)
    wp, bp = linear(k3, hidden, act_dim)
    wv, bv = linear(k4, hidden, 1)
    return dict(w1=w1, b1=b1, w2=w2, b2=b2, wp=wp, bp=bp, wv=wv, bv=bv)


def reference_forward(x, p):
    h1 = jnp.maximum(x @ p["w1"] + p["b1"], 0.0)
    h2 = jnp.maximum(h1 @ p["w2"] + p["b2"], 0.0)
    return h2 @ p["wp"] + p["bp"], h2 @ p["wv"] + p["bv"]


if __name__ == "__main__":
    B, obs_dim, act_dim, hidden = 2, 16, 8, 32

    key = jax.random.PRNGKey(0)
    k_x, k_p = jax.random.split(key)
    x = jax.random.normal(k_x, (B, obs_dim), jnp.float32)
    params = init_params(k_p, obs_dim, act_dim, hidden)

    policy, value = actor_critic_forward(x, params)
    jax.block_until_ready((policy, value))

    # correctness check against pure-JAX reference
    ref_policy, ref_value = reference_forward(x, params)
    assert policy.shape == (B, act_dim) and value.shape == (B, 1)
    assert jnp.allclose(policy, ref_policy, atol=1e-5, rtol=1e-5)
    assert jnp.allclose(value, ref_value, atol=1e-5, rtol=1e-5)

    print("KERNEL_OK")
</pallas_src>

<mosaic_0001>
module attributes {stable_mosaic.version = 11 : i64} {
  func.func @actor_critic_kernel(%arg0: i32, %arg1: memref<8x128xf32, #tpu.memory_space<vmem>>, %arg2: memref<128x128xf32, #tpu.memory_space<vmem>>, %arg3: memref<128x256xf32, #tpu.memory_space<vmem>>, %arg4: memref<1x384xf32, #tpu.memory_space<vmem>>, %arg5: memref<8x128xf32, #tpu.memory_space<vmem>>) attributes {dimension_semantics = [#tpu.dimension_semantics<parallel>], iteration_bounds = array<i64: 1>, scalar_prefetch = 0 : i64, scratch_operands = 0 : i64, tpu.core_type = #tpu.core_type<tc>, window_params = [{transform_indices = @transform_0, window_bounds = array<i64: 8, 128>}, {pipeline_mode = #tpu.pipeline_mode<synchronous>, transform_indices = @transform_1, window_bounds = array<i64: 128, 128>}, {pipeline_mode = #tpu.pipeline_mode<synchronous>, transform_indices = @transform_2, window_bounds = array<i64: 128, 256>}, {pipeline_mode = #tpu.pipeline_mode<synchronous>, transform_indices = @transform_3, window_bounds = array<i64: 1, 384>}, {transform_indices = @transform_4, window_bounds = array<i64: 8, 128>}]} {
    %c0 = arith.constant 0 : index
    %c0_0 = arith.constant 0 : index
    %0 = vector.load %arg1[%c0, %c0_0] : memref<8x128xf32, #tpu.memory_space<vmem>>, vector<8x128xf32>
    %c0_1 = arith.constant 0 : index
    %c0_2 = arith.constant 0 : index
    %1 = vector.load %arg3[%c0_1, %c0_2] : memref<128x256xf32, #tpu.memory_space<vmem>>, vector<128x128xf32>
    %c0_3 = arith.constant 0 : index
    %c128 = arith.constant 128 : index
    %2 = vector.load %arg3[%c0_3, %c128] : memref<128x256xf32, #tpu.memory_space<vmem>>, vector<128x128xf32>
    %c0_4 = arith.constant 0 : index
    %c0_5 = arith.constant 0 : index
    %3 = vector.load %arg4[%c0_4, %c0_5] : memref<1x384xf32, #tpu.memory_space<vmem>>, vector<1x128xf32>
    %c0_6 = arith.constant 0 : index
    %c128_7 = arith.constant 128 : index
    %4 = vector.load %arg4[%c0_6, %c128_7] : memref<1x384xf32, #tpu.memory_space<vmem>>, vector<1x128xf32>
    %c0_8 = arith.constant 0 : index
    %c256 = arith.constant 256 : index
    %5 = vector.load %arg4[%c0_8, %c256] : memref<1x384xf32, #tpu.memory_space<vmem>>, vector<1x128xf32>
    %c0_9 = arith.constant 0 : index
    %c0_10 = arith.constant 0 : index
    %6 = vector.load %arg2[%c0_9, %c0_10] : memref<128x128xf32, #tpu.memory_space<vmem>>, vector<128x128xf32>
    %cst = arith.constant dense<0.000000e+00> : vector<8x128xf32>
    %7 = tpu.matmul %0, %6, %cst {dimension_numbers = #tpu.dot_dimension_numbers<[1], [0], [0], [1], [0, 0, 1, 1], [], []>} : vector<8x128xf32>, vector<128x128xf32>, vector<8x128xf32> -> vector<8x128xf32>
    %8 = vector.broadcast %3 : vector<1x128xf32> to vector<8x128xf32>
    %9 = arith.addf %7, %8 : vector<8x128xf32>
    %cst_11 = arith.constant 0.000000e+00 : f32
    %10 = vector.broadcast %cst_11 : f32 to vector<8x128xf32>
    %11 = arith.maximumf %9, %10 : vector<8x128xf32>
    %cst_12 = arith.constant dense<0.000000e+00> : vector<8x128xf32>
    %12 = tpu.matmul %11, %1, %cst_12 {dimension_numbers = #tpu.dot_dimension_numbers<[1], [0], [0], [1], [0, 0, 1, 1], [], []>} : vector<8x128xf32>, vector<128x128xf32>, vector<8x128xf32> -> vector<8x128xf32>
    %13 = vector.broadcast %4 : vector<1x128xf32> to vector<8x128xf32>
    %14 = arith.addf %12, %13 : vector<8x128xf32>
    %cst_13 = arith.constant 0.000000e+00 : f32
    %15 = vector.broadcast %cst_13 : f32 to vector<8x128xf32>
    %16 = arith.maximumf %14, %15 : vector<8x128xf32>
    %cst_14 = arith.constant dense<0.000000e+00> : vector<8x128xf32>
    %17 = tpu.matmul %16, %2, %cst_14 {dimension_numbers = #tpu.dot_dimension_numbers<[1], [0], [0], [1], [0, 0, 1, 1], [], []>} : vector<8x128xf32>, vector<128x128xf32>, vector<8x128xf32> -> vector<8x128xf32>
    %18 = vector.broadcast %5 : vector<1x128xf32> to vector<8x128xf32>
    %19 = arith.addf %17, %18 : vector<8x128xf32>
    %c0_15 = arith.constant 0 : index
    %c0_16 = arith.constant 0 : index
    %20 = vector.load %arg5[%c0_15, %c0_16] : memref<8x128xf32, #tpu.memory_space<vmem>>, vector<8x128xf32>
    tpu.vector_store %arg5[%c0_15, %c0_16], %19 {strides = array<i32>} : memref<8x128xf32, #tpu.memory_space<vmem>>, vector<8x128xf32>,
    return
  }
  func.func @transform_0(%arg0: i32) -> (i32, i32) {
    %c0_i32 = arith.constant 0 : i32
    %c0_i32_0 = arith.constant 0 : i32
    return %arg0, %c0_i32 : i32, i32
  }
  func.func @transform_1(%arg0: i32) -> (i32, i32) {
    %c0_i32 = arith.constant 0 : i32
    %c0_i32_0 = arith.constant 0 : i32
    %c0_i32_1 = arith.constant 0 : i32
    return %c0_i32, %c0_i32_0 : i32, i32
  }
  func.func @transform_2(%arg0: i32) -> (i32, i32) {
    %c0_i32 = arith.constant 0 : i32
    %c0_i32_0 = arith.constant 0 : i32
    %c0_i32_1 = arith.constant 0 : i32
    return %c0_i32, %c0_i32_0 : i32, i32
  }
  func.func @transform_3(%arg0: i32) -> (i32, i32) {
    %c0_i32 = arith.constant 0 : i32
    %c0_i32_0 = arith.constant 0 : i32
    %c0_i32_1 = arith.constant 0 : i32
    return %c0_i32, %c0_i32_0 : i32, i32
  }
  func.func @transform_4(%arg0: i32) -> (i32, i32) {
    %c0_i32 = arith.constant 0 : i32
    %c0_i32_0 = arith.constant 0 : i32
    return %arg0, %c0_i32 : i32, i32
  }
}

</mosaic_0001>

<bundles_post_ra>
// kernel: tpu_custom_call.1
= control target key start
LH: loop header
LB: loop body
LE: loop exit
PB: predicated region body
PF: predicated region fallthrough
CT: control target
= control target key end

     0   :  { %9 = vsyncpa [#allocation3], 0  ;;  %s409_s0 = inlined_call_operand.hbm [shape: f32[8,128], index: 0, kind: input, shape index: {}]   ;;  %s410_s1 = inlined_call_operand.hbm [shape: f32[128,128], index: 1, kind: input, shape index: {}]   ;;  %s411_s2 = inlined_call_operand.hbm [shape: f32[128,256], index: 2, kind: input, shape index: {}]   ;;  %s412_s3 = inlined_call_operand.hbm [shape: f32[1,384], index: 3, kind: input, shape index: {}]   ;;  %s413_s4 = inlined_call_operand.hbm [shape: f32[8,128], index: 4, kind: output, shape index: {}]  }
   0x1   :  { %10 = vsyncpa [#allocation6], 0 }
   0x2   :  { %11 = vsyncpa [#allocation9], 0  ;;  %s28_s17 = sshll.u32 %s410_s1, 4  ;;  %s29_s17 = int_to_ptr.hbm [resolvable:$true] %s28_s17 }
   0x3   :  { %12 = vsyncpa [#allocation4], 0  ;;  %s360_s18 = smov [#allocation5]   ;;  %s18_s22 = sshll.u32 %s409_s0, 4  ;;  %s19_s22 = int_to_ptr.hbm [resolvable:$true] %s18_s22 }
   0x4   :  { %s30_s19 = sshll.u32 %s360_s18, 4  ;;  %s361_s23 = smov 128   ;;  %s31_s19 = int_to_ptr.vmem [resolvable:$true] %s30_s19 }
   0x5   :  { %s362_s24 = smov 8   ;;  %s363_s25 = smov [#allocation2]  }
   0x6   :  { %36 = dma.hbm_to_vmem [thread:$0]  %s29_s17, 2048, %s31_s19, [#allocation6], %s361_s23, %s361_s23, %s362_s24  }
   0x7   :  { %s20_s26 = sshll.u32 %s363_s25, 4  ;;  %s41_s29 = sshll.u32 %s411_s2, 4  ;;  %s21_s26 = int_to_ptr.vmem [resolvable:$true] %s20_s26  ;;  %s42_s29 = int_to_ptr.hbm [resolvable:$true] %s41_s29 }
   0x8   :  { %23 = dma.hbm_to_vmem [thread:$0]  %s19_s22, 128, %s21_s26, [#allocation3]  }
   0x9   :  { %s364_s1 = smov [#allocation7]   ;;  %s55_s0 = sshll.u32 %s412_s3, 4  ;;  %s56_s0 = int_to_ptr.hbm [resolvable:$true] %s55_s0 }
   0xa   :  { %s43_s30 = sshll.u32 %s364_s1, 4  ;;  %s365_s7 = smov 256   ;;  %s44_s30 = int_to_ptr.vmem [resolvable:$true] %s43_s30 }
   0xb   :  { %s366_s8 = smov 16   ;;  %s367_s9 = smov [#allocation8]  }
   0xc   :  { %49 = dma.hbm_to_vmem [thread:$0]  %s42_s29, 4096, %s44_s30, [#allocation6], %s365_s7, %s365_s7, %s366_s8  }
   0xd   :  { %s57_s10 = sshll.u32 %s367_s9, 4  ;;  %s58_s10 = int_to_ptr.vmem [resolvable:$true] %s57_s10 }
   0xe   :  { %60 = dma.hbm_to_vmem [thread:$0]  %s56_s0, 48, %s58_s10, [#allocation9]  }
   0xf   :  { %352 = dma.done.wait [#allocation3], 128  }
  0x10   :  { %353 = vsyncadd [#allocation3], 4294967168 }
  0x11   :  { %354 = dma.done.wait [#allocation6], 6144  }
  0x12   :  { %355 = vsyncadd [#allocation6], 4294961152 }
  0x13   :  { %356 = dma.done.wait [#allocation9], 48  }
  0x14   :  { %357 = vsyncadd [#allocation9], 4294967248  ;;  %v128_v0 = vld [vmem:[#allocation5 + $0x78] sm:$0xff]  ;;  %v127_v1 = vld [vmem:[#allocation5 + $0x70] sm:$0xff]  ;;  %s368_s2 = smov [#allocation10]   ;;  %s208_s13 = sshll.u32 %s413_s4, 4  ;;  %s209_s13 = int_to_ptr.hbm [resolvable:$true] %s208_s13 }
  0x15   :  { %132 = vmatpush.msra.mxu0 %v128_v0  ;;  %v126_v2 = vld [vmem:[#allocation5 + $0x68] sm:$0xff]  ;;  %v125_v3 = vld [vmem:[#allocation5 + $0x60] sm:$0xff]  ;;  %v93_v4 = vld [vmem:[#allocation7 + $0xf0] sm:$0xff]  ;;  %s206_s3 = sshll.u32 %s368_s2, 4  ;;  %s207_s3 = int_to_ptr.vmem [resolvable:$true] %s206_s3 }
  0x16   :  { %v124_v5 = vld [vmem:[#allocation5 + $0x58] sm:$0xff]  ;;  %156 = vmatpush.msra.mxu1 %v93_v4  ;;  %v92_v6 = vld [vmem:[#allocation7 + $0xe0] sm:$0xff]  ;;  %v91_v7 = vld [vmem:[#allocation7 + $0xd0] sm:$0xff] }
  0x17   :  { %133 = vmatpush.msra.mxu0 %v127_v1  ;;  %v123_v8 = vld [vmem:[#allocation5 + $0x50] sm:$0xff]  ;;  %v90_v9 = vld [vmem:[#allocation7 + $0xc0] sm:$0xff]  ;;  %v122_v10 = vld [vmem:[#allocation5 + $0x48] sm:$0xff] }
  0x18   :  { %157 = vmatpush.msra.mxu1 %v92_v6  ;;  %v89_v11 = vld [vmem:[#allocation7 + $0xb0] sm:$0xff]  ;;  %v121_v12 = vld [vmem:[#allocation5 + $0x40] sm:$0xff]  ;;  %v120_v14 = vld [vmem:[#allocation5 + $0x38] sm:$0xff] }
  0x19   :  { %134 = vmatpush.msra.mxu0 %v126_v2  ;;  %v88_v13 = vld [vmem:[#allocation7 + $0xa0] sm:$0xff]  ;;  %v87_v15 = vld [vmem:[#allocation7 + $0x90] sm:$0xff]  ;;  %v118_v18 = vld [vmem:[#allocation5 + $0x28] sm:$0xff] }
  0x1a   :  { %158 = vmatpush.msra.mxu1 %v91_v7  ;;  %v119_v16 = vld [vmem:[#allocation5 + $0x30] sm:$0xff]  ;;  %v86_v17 = vld [vmem:[#allocation7 + $0x80] sm:$0xff]  ;;  %v116_v22 = vld [vmem:[#allocation5 + $0x18] sm:$0xff] }
  0x1b   :  { %135 = vmatpush.msra.mxu0 %v125_v3  ;;  %v85_v19 = vld [vmem:[#allocation7 + $0x70] sm:$0xff]  ;;  %v117_v20 = vld [vmem:[#allocation5 + $0x20] sm:$0xff]  ;;  %v114_v26 = vld [vmem:[#allocation5 + $0x8] sm:$0xff] }
  0x1c   :  { %159 = vmatpush.msra.mxu1 %v90_v9  ;;  %v84_v21 = vld [vmem:[#allocation7 + $0x60] sm:$0xff]  ;;  %v83_v23 = vld [vmem:[#allocation7 + $0x50] sm:$0xff]  ;;  %v77_v29 = vld [vmem:[#allocation2] sm:$0xff] }
  0x1d   :  { %136 = vmatpush.msra.mxu0 %v124_v5  ;;  %v115_v24 = vld [vmem:[#allocation5 + $0x10] sm:$0xff]  ;;  %v82_v25 = vld [vmem:[#allocation7 + $0x40] sm:$0xff]  ;;  %v109_v33 = vld [vmem:[#allocation7 + $0xf8] sm:$0xff] }
  0x1e   :  { %160 = vmatpush.msra.mxu1 %v89_v11  ;;  %v81_v27 = vld [vmem:[#allocation7 + $0x30] sm:$0xff]  ;;  %v113_v28 = vld [vmem:[#allocation5] sm:$0xff]  ;;  %v108_v34 = vld [vmem:[#allocation7 + $0xe8] sm:$0xff]  ;;  %180 = vmatpush.msra.mxu2 %v109_v33 }
  0x1f   :  { %137 = vmatpush.msra.mxu0 %v123_v8  ;;  %v80_v30 = vld [vmem:[#allocation7 + $0x20] sm:$0xff]  ;;  %v79_v31 = vld [vmem:[#allocation7 + $0x10] sm:$0xff]  ;;  %v107_v35 = vld [vmem:[#allocation7 + $0xd8] sm:$0xff] }
  0x20   :  { %161 = vmatpush.msra.mxu1 %v88_v13  ;;  %v78_v32 = vld [vmem:[#allocation7] sm:$0xff]  ;;  %181 = vmatpush.msra.mxu2 %v108_v34  ;;  %v106_v36 = vld [vmem:[#allocation7 + $0xc8] sm:$0xff]  ;;  %v105_v37 = vld [vmem:[#allocation7 + $0xb8] sm:$0xff] }
  0x21   :  { %138 = vmatpush.msra.mxu0 %v122_v10  ;;  %v104_v38 = vld [vmem:[#allocation7 + $0xa8] sm:$0xff]  ;;  %v103_v39 = vld [vmem:[#allocation7 + $0x98] sm:$0xff]  ;;  %v229_v46 = vld [vmem:[#allocation8] ss:$0 sm:$0xff] }
  0x22   :  { %162 = vmatpush.msra.mxu1 %v87_v15  ;;  %182 = vmatpush.msra.mxu2 %v107_v35  ;;  %v102_v40 = vld [vmem:[#allocation7 + $0x88] sm:$0xff]  ;;  %v101_v41 = vld [vmem:[#allocation7 + $0x78] sm:$0xff]  ;;  %v230_v53 = vld [vmem:[#allocation8 + $0x1] ss:$0 sm:$0xff] }
  0x23   :  { %139 = vmatpush.msra.mxu0 %v121_v12  ;;  %v100_v42 = vld [vmem:[#allocation7 + $0x68] sm:$0xff]  ;;  %v99_v43 = vld [vmem:[#allocation7 + $0x58] sm:$0xff]  ;;  %v231_v57 = vld [vmem:[#allocation8 + $0x2] ss:$0 sm:$0xff] }
  0x24   :  { %163 = vmatpush.msra.mxu1 %v86_v17  ;;  %183 = vmatpush.msra.mxu2 %v106_v36  ;;  %v98_v44 = vld [vmem:[#allocation7 + $0x48] sm:$0xff]  ;;  %v97_v45 = vld [vmem:[#allocation7 + $0x38] sm:$0xff] }
  0x25   :  { %140 = vmatpush.msra.mxu0 %v120_v14  ;;  %v96_v50 = vld [vmem:[#allocation7 + $0x28] sm:$0xff]  ;;  %v95_v51 = vld [vmem:[#allocation7 + $0x18] sm:$0xff] }
  0x26   :  { %164 = vmatpush.msra.mxu1 %v85_v19  ;;  %184 = vmatpush.msra.mxu2 %v105_v37  ;;  %v94_v52 = vld [vmem:[#allocation7 + $0x8] sm:$0xff] }
  0x27   :  { %141 = vmatpush.msra.mxu0 %v119_v16 }
  0x28   :  { %165 = vmatpush.msra.mxu1 %v84_v21  ;;  %185 = vmatpush.msra.mxu2 %v104_v38 }
  0x29   :  { %142 = vmatpush.msra.mxu0 %v118_v18 }
  0x2a   :  { %166 = vmatpush.msra.mxu1 %v83_v23  ;;  %186 = vmatpush.msra.mxu2 %v103_v39 }
  0x2b   :  { %143 = vmatpush.msra.mxu0 %v117_v20 }
  0x2c   :  { %167 = vmatpush.msra.mxu1 %v82_v25  ;;  %187 = vmatpush.msra.mxu2 %v102_v40 }
  0x2d   :  { %144 = vmatpush.msra.mxu0 %v116_v22 }
  0x2e   :  { %168 = vmatpush.msra.mxu1 %v81_v27  ;;  %188 = vmatpush.msra.mxu2 %v101_v41 }
  0x2f   :  { %145 = vmatpush.msra.mxu0 %v115_v24 }
  0x30   :  { %169 = vmatpush.msra.mxu1 %v80_v30  ;;  %189 = vmatpush.msra.mxu2 %v100_v42 }
  0x31   :  { %146 = vmatpush.msra.mxu0 %v114_v26 }
  0x32   :  { %170 = vmatpush.msra.mxu1 %v79_v31  ;;  %190 = vmatpush.msra.mxu2 %v99_v43 }
  0x33   :  { %147 = vmatpush.msra.mxu0 %v113_v28 }
  0x34   :  { %148 = vmatmul.f32.vlgmr.msra.gmra.mxu0 %v77_v29  ;;  %171 = vmatpush.msra.mxu1 %v78_v32 }
  0x35   :  { %191 = vmatpush.msra.mxu2 %v98_v44 }
  0x37   :  { %192 = vmatpush.msra.mxu2 %v97_v45 }
  0x39   :  { %193 = vmatpush.msra.mxu2 %v96_v50 }
  0x3b   :  { %194 = vmatpush.msra.mxu2 %v95_v51 }
  0x3d   :  { %195 = vmatpush.msra.mxu2 %v94_v52 }
  0xb1   :  { %v149_v47 = vpop.f32.mrf.mxu0 }
  0xb2   :  { %v150_v48 = vadd.f32 %v229_v46, %v149_v47 }
  0xb4   :  { %v152_v49 = vmax.f32 %v150_v48, 0.0 }
  0xb6   :  { %172 = vmatmul.f32.vlgmr.msra.gmra.mxu1 %v152_v49 }
 0x133   :  { %v173_v54 = vpop.f32.mrf.mxu1 }
 0x134   :  { %v174_v55 = vadd.f32 %v230_v53, %v173_v54 }
 0x136   :  { %v176_v56 = vmax.f32 %v174_v55, 0.0 }
 0x138   :  { %196 = vmatmul.f32.vlgmr.msra.gmra.mxu2 %v176_v56 }
 0x1bb   :  { %v197_v58 = vpop.f32.mrf.mxu2 }
 0x1bc   :  { %v198_v59 = vadd.f32 %v231_v57, %v197_v58 }
 0x1be   :  { %200 = vst [vmem:[#allocation10] sm:$0xff] %v198_v59 }
 0x1bf   :  { %211 = dma.vmem_to_hbm [thread:$0]  %s207_s3, 128, %s209_s13, [#allocation4]  }
 0x1c0   :  { %358 = dma.done.wait [#allocation4], 128  }
 0x1c1   :  { %359 = vsyncadd [#allocation4], 4294967168 }
 0x1c2   :  { %216 = vsyncpa [#allocation3], 1 }
 0x1c3   :  { %217 = vsyncpa [#allocation6], 1 }
 0x1c4   :  { %218 = vsyncpa [#allocation9], 1 }
 0x1c5   :  { %219 = vsyncpa [#allocation4], 1 }

</bundles_post_ra>
